<compile_context>
chip_gen: v6e
topology: v6e:2x2x1
jax: 0.10.0
libtpu: 0.0.40
codegen_flags: <defaults>
</compile_context>

<pallas_src>
import functools
import math

import jax
import jax.numpy as jnp
from jax.experimental import pallas as pl
from jax.experimental.pallas import tpu as pltpu


def _round_up(x, m):
    return (x + m - 1) // m * m


# ----------------------------------------------------------------------------
# Fused matmul:  out = act(A @ W + bias) [* mul]
#   A: (M, K) bf16 (cast in wrapper),  W: (K, N) bf16 (pre-padded at init)
#   bias: (1, N) f32 (BN folded),      mul/out: f32
# ----------------------------------------------------------------------------
def _kn_tiles(K, N):
    """Tile/padding choice for the (K, N) dims of a weight matrix."""
    Np128 = _round_up(N, 128)
    # Lane-dense output tiles; keep TN=128 for N<=384 so the j axis still has
    # >=2 parallel tiles on the common 256-wide outputs (v7x megacore).
    TN = 256 if Np128 >= 512 else 128
    Np = _round_up(N, TN)
    TK = min(512, _round_up(K, 128))
    Kp = _round_up(K, TK)
    return TK, Kp, TN, Np


def _make_mm_kernel(act, has_mul):
    def kernel(*refs):
        if has_mul:
            a_ref, b_ref, c_ref, m_ref, o_ref, acc_ref = refs
        else:
            a_ref, b_ref, c_ref, o_ref, acc_ref = refs

        @pl.when(pl.program_id(2) == 0)
        def _():
            acc_ref[...] = jnp.zeros_like(acc_ref)

        acc_ref[...] += jnp.dot(a_ref[...], b_ref[...],
                                preferred_element_type=jnp.float32)

        @pl.when(pl.program_id(2) == pl.num_programs(2) - 1)
        def _():
            y = acc_ref[...] + c_ref[...]
            if act == "relu":
                y = jnp.maximum(y, 0.0)
            elif act == "sigmoid":
                y = jax.nn.sigmoid(y)
            if has_mul:
                y = y * m_ref[...]
            o_ref[...] = y.astype(o_ref.dtype)

    return kernel


@functools.lru_cache(maxsize=None)
def _mm_call(Mp, Kp, Np, TM, TK, TN, act, has_mul):
    kernel = _make_mm_kernel(act, has_mul)
    grid = (Mp // TM, Np // TN, Kp // TK)
    in_specs = [
        pl.BlockSpec((TM, TK), lambda i, j, k: (i, k)),   # A (bf16)
        pl.BlockSpec((TK, TN), lambda i, j, k: (k, j)),   # W (bf16)
        pl.BlockSpec((1, TN), lambda i, j, k: (0, j)),    # bias (f32)
    ]
    if has_mul:
        in_specs.append(pl.BlockSpec((TM, TN), lambda i, j, k: (i, j)))
    return pl.pallas_call(
        kernel,
        out_shape=jax.ShapeDtypeStruct((Mp, Np), jnp.float32),
        grid_spec=pltpu.PrefetchScalarGridSpec(
            num_scalar_prefetch=0,
            grid=grid,
            in_specs=in_specs,
            out_specs=pl.BlockSpec((TM, TN), lambda i, j, k: (i, j)),
            scratch_shapes=[pltpu.VMEM((TM, TN), jnp.float32)],
        ),
        compiler_params=pltpu.CompilerParams(
            dimension_semantics=("parallel", "parallel", "arbitrary")),
    )


def _prep_linear(w, b):
    """Pre-pad / bf16-cast a (K, N) weight + (N,) bias once at init time."""
    K, N = w.shape
    TK, Kp, TN, Np = _kn_tiles(K, N)
    return {
        "w": jnp.pad(w.astype(jnp.float32),
                     ((0, Kp - K), (0, Np - N))).astype(jnp.bfloat16),
        "b": jnp.pad(b.reshape(1, N).astype(jnp.float32),
                     ((0, 0), (0, Np - N))),
        "K": K, "N": N, "TK": TK, "TN": TN,
    }


def linear(a, layer, *, act="none", mul=None):
    """act(a @ W + b) [* mul] using the fused Pallas matmul kernel."""
    M, K = a.shape
    assert K == layer["K"], (K, layer["K"])
    N, TK, TN = layer["N"], layer["TK"], layer["TN"]
    Kp, Np = layer["w"].shape
    TM = min(256, _round_up(M, 8))
    Mp = _round_up(M, TM)
    a_p = jnp.pad(a, ((0, Mp - M), (0, Kp - K))).astype(jnp.bfloat16)
    args = [a_p, layer["w"], layer["b"]]
    if mul is not None:
        args.append(jnp.pad(mul.astype(jnp.float32),
                            ((0, Mp - M), (0, Np - N))))
    out = _mm_call(Mp, Kp, Np, TM, TK, TN, act, mul is not None)(*args)
    return out[:M, :N]


# ----------------------------------------------------------------------------
# Fused softmax attention (per batch):  softmax(Q K^T * scale) @ V
# optionally followed by  gamma * out + residual   (SAGAN path)
# ----------------------------------------------------------------------------
def _make_attn_kernel(scale, has_res):
    def kernel(*refs):
        if has_res:
            q_ref, k_ref, v_ref, g_ref, r_ref, o_ref = refs
        else:
            q_ref, k_ref, v_ref, o_ref = refs
        # Q @ K^T on the MXU (contract last dims of both), f32 accumulation.
        s = jax.lax.dot_general(
            q_ref[...], k_ref[...], (((1,), (1,)), ((), ())),
            preferred_element_type=jnp.float32) * scale
        m = jnp.max(s, axis=-1, keepdims=True)
        p = jnp.exp(s - m)
        denom = jnp.sum(p, axis=-1, keepdims=True)
        p = p * pl.reciprocal(denom, approx=True)
        out = jnp.dot(p.astype(v_ref.dtype), v_ref[...],
                      preferred_element_type=jnp.float32)
        if has_res:
            out = g_ref[0, 0] * out + r_ref[...]
        o_ref[...] = out.astype(o_ref.dtype)

    return kernel


@functools.lru_cache(maxsize=None)
def _attn_call(B, N, dk, dv, scale, has_res):
    kernel = _make_attn_kernel(scale, has_res)
    in_specs = [
        pl.BlockSpec((None, N, dk), lambda b: (b, 0, 0)),   # Q
        pl.BlockSpec((None, N, dk), lambda b: (b, 0, 0)),   # K
        pl.BlockSpec((None, N, dv), lambda b: (b, 0, 0)),   # V
    ]
    if has_res:
        in_specs.append(pl.BlockSpec(memory_space=pltpu.MemorySpace.SMEM))  # gamma
        in_specs.append(pl.BlockSpec((None, N, dv), lambda b: (b, 0, 0)))   # residual
    return pl.pallas_call(
        kernel,
        out_shape=jax.ShapeDtypeStruct((B, N, dv), jnp.float32),
        grid_spec=pltpu.PrefetchScalarGridSpec(
            num_scalar_prefetch=0,
            grid=(B,),
            in_specs=in_specs,
            out_specs=pl.BlockSpec((None, N, dv), lambda b: (b, 0, 0)),
        ),
        compiler_params=pltpu.CompilerParams(
            dimension_semantics=("parallel",)),
    )


def fused_attention(q, k, v, *, scale=1.0, gamma=None, residual=None):
    B, N, dk = q.shape
    dv = v.shape[-1]
    has_res = residual is not None
    args = [q.astype(jnp.bfloat16), k.astype(jnp.bfloat16),
            v.astype(jnp.bfloat16)]
    if has_res:
        args.append(jnp.asarray(gamma, jnp.float32).reshape(1, 1))
        args.append(residual.astype(jnp.float32))
    return _attn_call(B, N, dk, dv, float(scale), has_res)(*args)


# ----------------------------------------------------------------------------
# simam:  out = x * sigmoid( (x-mu)^2 / (4*(sum((x-mu)^2)/(n) + eps)) + 0.5 )
# (statistics over spatial positions per (batch, channel))
# ----------------------------------------------------------------------------
def _make_simam_kernel(n, e_lambda):
    def kernel(x_ref, o_ref):
        x = x_ref[...]                                  # (N, C) f32
        mu = jnp.mean(x, axis=0, keepdims=True)
        d2 = (x - mu) * (x - mu)
        s = jnp.sum(d2, axis=0, keepdims=True)
        y = d2 / (4.0 * (s * (1.0 / n) + e_lambda)) + 0.5
        o_ref[...] = x * jax.nn.sigmoid(y)

    return kernel


@functools.lru_cache(maxsize=None)
def _simam_call(B, N, C, n, e_lambda):
    kernel = _make_simam_kernel(n, e_lambda)
    return pl.pallas_call(
        kernel,
        out_shape=jax.ShapeDtypeStruct((B, N, C), jnp.float32),
        grid_spec=pltpu.PrefetchScalarGridSpec(
            num_scalar_prefetch=0,
            grid=(B,),
            in_specs=[pl.BlockSpec((None, N, C), lambda b: (b, 0, 0))],
            out_specs=pl.BlockSpec((None, N, C), lambda b: (b, 0, 0)),
        ),
        compiler_params=pltpu.CompilerParams(
            dimension_semantics=("parallel",)),
    )


def simam(x_bnc, e_lambda=1e-6):
    B, N, C = x_bnc.shape
    return _simam_call(B, N, C, float(N - 1), float(e_lambda))(
        x_bnc.astype(jnp.float32))


# ----------------------------------------------------------------------------
# im2col for the 7x7 "same" convolutions in GAM's spatial attention.
# TODO(synk): at realistic resolutions, do the 7x7 tap gather inside the kernel
# with manual DMAs (memory_space=pl.ANY) instead of materializing patches.
# ----------------------------------------------------------------------------
def _im2col_same(x_nhwc, ksize, pad):
    B, H, W, C = x_nhwc.shape
    xp = jnp.pad(x_nhwc, ((0, 0), (pad, pad), (pad, pad), (0, 0)))
    cols = []
    for kh in range(ksize):
        for kw in range(ksize):
            cols.append(xp[:, kh:kh + H, kw:kw + W, :])
    return jnp.concatenate(cols, axis=-1).reshape(B * H * W, ksize * ksize * C)


# ----------------------------------------------------------------------------
# Deterministic synthetic parameters (layout: weights already in matmul form,
# BatchNorm folded, padded and bf16-cast once here).
# ----------------------------------------------------------------------------
def init_self_attn_params(key, in_dim=256, rate=4, num_heads=1):
    assert in_dim == 256, "dim=256 is hard-coded inside the reference Self_Attn"
    ks = iter(jax.random.split(key, 32))

    def lin(cin, cout):
        w = jax.random.normal(next(ks), (cin, cout), jnp.float32) * \
            math.sqrt(2.0 / cin)
        b = 0.01 * jax.random.normal(next(ks), (cout,), jnp.float32)
        return w, b

    def bn(c):
        g = 1.0 + 0.1 * jax.random.normal(next(ks), (c,), jnp.float32)
        beta = 0.1 * jax.random.normal(next(ks), (c,), jnp.float32)
        mean = 0.1 * jax.random.normal(next(ks), (c,), jnp.float32)
        var = 0.9 + 0.2 * jax.random.uniform(next(ks), (c,), jnp.float32)
        return g, beta, mean, var

    c8 = in_dim // 8
    cr = in_dim // rate
    p = {}
    # SAGAN 1x1 convs (bias=True)
    p["query"] = _prep_linear(*lin(in_dim, c8))
    p["key"] = _prep_linear(*lin(in_dim, c8))
    p["value"] = _prep_linear(*lin(in_dim, in_dim))
    p["gamma"] = jnp.zeros((1, 1), jnp.float32)      # nn.Parameter(torch.zeros(1))
    # GAM channel-attention MLP
    p["ca1"] = _prep_linear(*lin(in_dim, cr))
    p["ca2"] = _prep_linear(*lin(cr, in_dim))
    # GAM spatial attention: 7x7 conv + BN folded (inference mode), x2
    w1, b1 = lin(49 * in_dim, cr)                    # (KH*KW*Cin, Cout)
    g1, be1, mu1, var1 = bn(cr)
    s1 = g1 / jnp.sqrt(var1 + 1e-5)
    p["sa1"] = _prep_linear(w1 * s1[None, :], (b1 - mu1) * s1 + be1)
    w2, b2 = lin(49 * cr, in_dim)
    g2, be2, mu2, var2 = bn(in_dim)
    s2 = g2 / jnp.sqrt(var2 + 1e-5)
    p["sa2"] = _prep_linear(w2 * s2[None, :], (b2 - mu2) * s2 + be2)
    # Transformer branch (dim = 256, num_heads = 1, qkv_bias = True)
    p["qkv"] = _prep_linear(*lin(in_dim, 3 * in_dim))
    p["proj"] = _prep_linear(*lin(in_dim, in_dim))
    p["scale"] = (in_dim // num_heads) ** (-0.5)
    return p


# ----------------------------------------------------------------------------
# Forward pass (matches Self_Attn.forward)
# ----------------------------------------------------------------------------
def self_attn_forward(x_nchw, params):
    B, C, W, H = x_nchw.shape
    N = W * H
    x_flat = jnp.transpose(x_nchw.astype(jnp.float32),
                           (0, 2, 3, 1)).reshape(B, N, C)     # (B, N, C)
    x2d = x_flat.reshape(B * N, C)

    # ---- stage 1: SAGAN self-attention, out = gamma * attn_out + x ---------
    q = linear(x2d, params["query"]).reshape(B, N, -1)        # (B, N, C/8)
    k = linear(x2d, params["key"]).reshape(B, N, -1)
    v = linear(x2d, params["value"]).reshape(B, N, -1)        # (B, N, C)
    out = fused_attention(q, k, v, scale=1.0,
                          gamma=params["gamma"], residual=x_flat)

    # ---- stage 2: GAM_Attention --------------------------------------------
    out2d = out.reshape(B * N, C)
    h1 = linear(out2d, params["ca1"], act="relu")
    x_ca2d = linear(h1, params["ca2"], act="none", mul=out2d)  # x * channel_att
    x_ca = x_ca2d.reshape(B, W, H, C)
    p1 = _im2col_same(x_ca, 7, 3)
    hs = linear(p1, params["sa1"], act="relu").reshape(B, W, H, -1)  # conv+BN+ReLU
    p2 = _im2col_same(hs, 7, 3)
    gam = linear(p2, params["sa2"], act="sigmoid", mul=x_ca2d)  # x * sigmoid(conv+BN)

    # ---- stage 3: simam ------------------------------------------------------
    out3 = simam(gam.reshape(B, N, C))
    # Matching the reference forward exactly: `out3` is computed but the
    # transformer branch below re-reads the ORIGINAL input x, so out3 does not
    # feed the returned tensor.
    del out3

    # ---- stage 4: single-head transformer attention on the original input --
    qkv = linear(x2d, params["qkv"]).reshape(B, N, 3, C)
    q2, k2, v2 = qkv[:, :, 0, :], qkv[:, :, 1, :], qkv[:, :, 2, :]
    a_out = fused_attention(q2, k2, v2, scale=params["scale"])   # (B, N, C)
    y = linear(a_out.reshape(B * N, C), params["proj"]).reshape(B, N, C)
    # attn_drop / proj_drop have ratio 0.0 -> identity
    return y


if __name__ == "__main__":
    key = jax.random.PRNGKey(0)
    pkey, xkey = jax.random.split(key)
    in_dim = 256                     # `dim = 256` is hard-coded in Self_Attn
    B, W, H = 2, 8, 8                # small spatial -> N = 64 tokens
    params = init_self_attn_params(pkey, in_dim=in_dim)
    x = jax.random.normal(xkey, (B, in_dim, W, H), jnp.float32)
    out = self_attn_forward(x, params)
    out = jax.block_until_ready(out)
    assert out.shape == (B, W * H, in_dim), out.shape
    assert out.dtype == jnp.float32
    assert bool(jnp.all(jnp.isfinite(out)))
    print("KERNEL_OK")
</pallas_src>

<mosaic_0001>
module attributes {stable_mosaic.version = 11 : i64} {
  func.func @kernel(%arg0: i32, %arg1: i32, %arg2: i32, %arg3: memref<128x256xbf16, #tpu.memory_space<vmem>>, %arg4: memref<256x128xbf16, #tpu.memory_space<vmem>>, %arg5: memref<1x128xf32, #tpu.memory_space<vmem>>, %arg6: memref<128x128xf32, #tpu.memory_space<vmem>>, %arg7: memref<128x128xf32, #tpu.memory_space<vmem>>) attributes {dimension_semantics = [#tpu.dimension_semantics<parallel>, #tpu.dimension_semantics<parallel>, #tpu.dimension_semantics<arbitrary>], iteration_bounds = array<i64: 1, 1, 1>, scalar_prefetch = 0 : i64, scratch_operands = 1 : i64, tpu.core_type = #tpu.core_type<tc>, window_params = [{transform_indices = @transform_0, window_bounds = array<i64: 128, 256>}, {transform_indices = @transform_1, window_bounds = array<i64: 256, 128>}, {transform_indices = @transform_2, window_bounds = array<i64: 1, 128>}, {transform_indices = @transform_3, window_bounds = array<i64: 128, 128>}]} {
    %c0_i32 = arith.constant 0 : i32
    %0 = arith.cmpi eq, %arg2, %c0_i32 : i32
    %1 = arith.extui %0 : i1 to i32
    %c0_i32_0 = arith.constant 0 : i32
    %2 = arith.cmpi ne, %1, %c0_i32_0 : i32
    scf.if %2 {
      %cst_10 = arith.constant 0.000000e+00 : f32
      %12 = vector.broadcast %cst_10 : f32 to vector<128x128xf32>
      %c0_11 = arith.constant 0 : index
      %c0_12 = arith.constant 0 : index
      %13 = vector.load %arg7[%c0_11, %c0_12] : memref<128x128xf32, #tpu.memory_space<vmem>>, vector<128x128xf32>
      tpu.vector_store %arg7[%c0_11, %c0_12], %12 {strides = array<i32>} : memref<128x128xf32, #tpu.memory_space<vmem>>, vector<128x128xf32>,
    } else {
    }
    %c0 = arith.constant 0 : index
    %c0_1 = arith.constant 0 : index
    %3 = vector.load %arg7[%c0, %c0_1] : memref<128x128xf32, #tpu.memory_space<vmem>>, vector<128x128xf32>
    %c0_2 = arith.constant 0 : index
    %c0_3 = arith.constant 0 : index
    %4 = vector.load %arg3[%c0_2, %c0_3] : memref<128x256xbf16, #tpu.memory_space<vmem>>, vector<128x256xbf16>
    %c0_4 = arith.constant 0 : index
    %c0_5 = arith.constant 0 : index
    %5 = vector.load %arg4[%c0_4, %c0_5] : memref<256x128xbf16, #tpu.memory_space<vmem>>, vector<256x128xbf16>
    %cst = arith.constant dense<0.000000e+00> : vector<128x128xf32>
    %6 = tpu.matmul %4, %5, %cst {dimension_numbers = #tpu.dot_dimension_numbers<[1], [0], [0], [1], [0, 0, 1, 1], [], []>} : vector<128x256xbf16>, vector<256x128xbf16>, vector<128x128xf32> -> vector<128x128xf32>
    %7 = arith.addf %3, %6 : vector<128x128xf32>
    %c0_6 = arith.constant 0 : index
    %c0_7 = arith.constant 0 : index
    %8 = vector.load %arg7[%c0_6, %c0_7] : memref<128x128xf32, #tpu.memory_space<vmem>>, vector<128x128xf32>
    tpu.vector_store %arg7[%c0_6, %c0_7], %7 {strides = array<i32>} : memref<128x128xf32, #tpu.memory_space<vmem>>, vector<128x128xf32>,
    %c0_i32_8 = arith.constant 0 : i32
    %9 = arith.cmpi eq, %arg2, %c0_i32_8 : i32
    %10 = arith.extui %9 : i1 to i32
    %c0_i32_9 = arith.constant 0 : i32
    %11 = arith.cmpi ne, %10, %c0_i32_9 : i32
    scf.if %11 {
      %c0_10 = arith.constant 0 : index
      %c0_11 = arith.constant 0 : index
      %12 = vector.load %arg7[%c0_10, %c0_11] : memref<128x128xf32, #tpu.memory_space<vmem>>, vector<128x128xf32>
      %c0_12 = arith.constant 0 : index
      %c0_13 = arith.constant 0 : index
      %13 = vector.load %arg5[%c0_12, %c0_13] : memref<1x128xf32, #tpu.memory_space<vmem>>, vector<1x128xf32>
      %14 = vector.broadcast %13 : vector<1x128xf32> to vector<128x128xf32>
      %15 = arith.addf %12, %14 : vector<128x128xf32>
      %c0_14 = arith.constant 0 : index
      %c0_15 = arith.constant 0 : index
      %16 = vector.load %arg6[%c0_14, %c0_15] : memref<128x128xf32, #tpu.memory_space<vmem>>, vector<128x128xf32>
      tpu.vector_store %arg6[%c0_14, %c0_15], %15 {strides = array<i32>} : memref<128x128xf32, #tpu.memory_space<vmem>>, vector<128x128xf32>,
    } else {
    }
    return
  }
  func.func @transform_0(%arg0: i32, %arg1: i32, %arg2: i32) -> (i32, i32) {
    %c0_i32 = arith.constant 0 : i32
    return %arg0, %arg2 : i32, i32
  }
  func.func @transform_1(%arg0: i32, %arg1: i32, %arg2: i32) -> (i32, i32) {
    %c0_i32 = arith.constant 0 : i32
    return %arg2, %arg1 : i32, i32
  }
  func.func @transform_2(%arg0: i32, %arg1: i32, %arg2: i32) -> (i32, i32) {
    %c0_i32 = arith.constant 0 : i32
    %c0_i32_0 = arith.constant 0 : i32
    return %c0_i32, %arg1 : i32, i32
  }
  func.func @transform_3(%arg0: i32, %arg1: i32, %arg2: i32) -> (i32, i32) {
    %c0_i32 = arith.constant 0 : i32
    return %arg0, %arg1 : i32, i32
  }
}

</mosaic_0001>

<bundles_post_ra>
// kernel: tpu_custom_call.1
= control target key start
LH: loop header
LB: loop body
LE: loop exit
PB: predicated region body
PF: predicated region fallthrough
CT: control target
= control target key end

     0   :  { %8 = vsyncpa [#allocation4], 0  ;;  %s798_s0 = inlined_call_operand.hbm [shape: bf16[128,256], index: 0, kind: input, shape index: {}]   ;;  %s799_s1 = inlined_call_operand.hbm [shape: bf16[256,128], index: 1, kind: input, shape index: {}]   ;;  %s800_s2 = inlined_call_operand.vmem [shape: f32[1,128], index: 2, kind: input, shape index: {}]   ;;  %s801_s3 = inlined_call_operand.hbm [shape: f32[128,128], index: 3, kind: output, shape index: {}]  }
   0x1   :  { %9 = vsyncpa [#allocation7], 0 }
   0x2   :  { %10 = vsyncpa [#allocation5], 0  ;;  %s735_s12 = smov [#allocation3]  }
   0x3   :  { %s16_s13 = sshll.u32 %s735_s12, 4  ;;  %s17_s13 = int_to_ptr.vmem [resolvable:$true] %s16_s13 }
   0x4   :  { %s677_s14 = scalar_lea.vmem %s17_s13, 2048  ;;  %p682_p1 = scmp.lt.s32.totalorder %s17_s13, %s17_s13 }
   0x5   :  { %p678_p0 = scmp.ne.s32.totalorder %s17_s13, %s677_s14  ;;  %p683_p2 = scmp.lt.s32.totalorder %s677_s14, %s677_s14 }
   0x7   :  { %p684_p3 = por %p683_p2, %p682_p1 }
   0x9   :  { %p685_p4 = pnand %p684_p3, %p678_p0 }
   0xb   :  { %688 = shalt.err (!%p685_p4)
}
   0xc   :  { %s736_s15 = smov 128   ;;  %s737_s16 = smov 8  }
   0xd   :  { %22 = dma.hbm_to_vmem [thread:$0]  %s798_s0, 2048, %s17_s13, [#allocation4], %s736_s15, %s736_s15, %s737_s16  }
   0xe   :  { %s738_s19 = smov [#allocation6]  }
   0xf   :  { %s28_s20 = sshll.u32 %s738_s19, 4  ;;  %s29_s20 = int_to_ptr.vmem [resolvable:$true] %s28_s20 }
  0x10   :  { %s697_s21 = scalar_lea.vmem %s29_s20, 2048  ;;  %p702_p6 = scmp.lt.s32.totalorder %s29_s20, %s29_s20 }
  0x11   :  { %p698_p5 = scmp.ne.s32.totalorder %s29_s20, %s697_s21  ;;  %p703_p7 = scmp.lt.s32.totalorder %s697_s21, %s697_s21 }
  0x13   :  { %p704_p8 = por %p703_p7, %p702_p6 }
  0x15   :  { %p705_p9 = pnand %p704_p8, %p698_p5 }
  0x17   :  { %708 = shalt.err (!%p705_p9)
}
  0x18   :  { %s739_s22 = smov 64   ;;  %s740_s23 = smov 4  }
  0x19   :  { %34 = dma.hbm_to_vmem [thread:$0]  %s799_s1, 2048, %s29_s20, [#allocation7], %s739_s22, %s739_s22, %s740_s23  }
  0x1a   :  { %729 = dma.done.wait [#allocation4], 2048  }
  0x1b   :  { %730 = vsyncadd [#allocation4], 4294965248 }
  0x1c   :  { %731 = dma.done.wait [#allocation7], 2048  }
  0x1d   :  { %732 = vsyncadd [#allocation7], 4294965248  ;;  %v629_v0 = vld [vmem:[#allocation6 + $0x78] sm:$0xff]   ;;  %v631_v2 = vld [vmem:[#allocation6 + $0x70] sm:$0xff]  }
  0x1e   :  { %v630_v1 = vld [vmem:[#allocation6 + $0x38] sm:$0xff]   ;;  %542 = vmatprep.subr.bf16.mxu0 %v629_v0  ;;  %606 = vmatprep.subr.bf16.mxu1 %v629_v0  ;;  %v632_v3 = vld [vmem:[#allocation6 + $0x30] sm:$0xff]   ;;  %v633_v4 = vld [vmem:[#allocation6 + $0x68] sm:$0xff]  }
  0x1f   :  { %543 = vmatpush3.bf16.msra.mxu0 %v630_v1  ;;  %614 = vmatpush3.bf16.msra.mxu1 %v630_v1  ;;  %v634_v5 = vld [vmem:[#allocation6 + $0x28] sm:$0xff]   ;;  %v635_v6 = vld [vmem:[#allocation6 + $0x60] sm:$0xff]   ;;  %v637_v8 = vld [vmem:[#allocation6 + $0x58] sm:$0xff]  }
  0x20   :  { %544 = vmatprep.subr.bf16.mxu0 %v631_v2  ;;  %607 = vmatprep.subr.bf16.mxu1 %v631_v2  ;;  %v636_v7 = vld [vmem:[#allocation6 + $0x20] sm:$0xff]   ;;  %v638_v9 = vld [vmem:[#allocation6 + $0x18] sm:$0xff]   ;;  %v639_v10 = vld [vmem:[#allocation6 + $0x50] sm:$0xff]  }
  0x21   :  { %v647_v11 = vld [vmem:[#allocation3 + $0x4] ss:$8 sps:$4 sm:$0xff]   ;;  %v640_v13 = vld [vmem:[#allocation6 + $0x10] sm:$0xff]   ;;  %v645_v18 = vld [vmem:[#allocation3] ss:$8 sps:$4 sm:$0xff]  }
  0x22   :  { %v650_v12 = vld [vmem:[#allocation3 + $0x44] ss:$8 sps:$4 sm:$0xff]   ;;  %336 = vmatprep.mubr.bf16.mxu0 %v647_v11  ;;  %v648_v19 = vld [vmem:[#allocation3 + $0x40] ss:$8 sps:$4 sm:$0xff]   ;;  %v651_v20 = vld [vmem:[#allocation3 + $0x14] ss:$8 sps:$4 sm:$0xff]  }
  0x23   :  { %545 = vmatpush3.bf16.msra.mxu0 %v632_v3  ;;  %615 = vmatpush3.bf16.msra.mxu1 %v632_v3  ;;  %v641_v14 = vld [vmem:[#allocation6 + $0x48] sm:$0xff]   ;;  %v643_v16 = vld [vmem:[#allocation6 + $0x40] sm:$0xff]   ;;  %v653_v21 = vld [vmem:[#allocation3 + $0x54] ss:$8 sps:$4 sm:$0xff]  }
  0x24   :  { %546 = vmatprep.subr.bf16.mxu0 %v633_v4  ;;  %608 = vmatprep.subr.bf16.mxu1 %v633_v4  ;;  %v642_v15 = vld [vmem:[#allocation6 + $0x8] sm:$0xff]   ;;  %v644_v17 = vld [vmem:[#allocation6] sm:$0xff]   ;;  %v655_v22 = vld [vmem:[#allocation3 + $0x10] ss:$8 sps:$4 sm:$0xff]  }
  0x25   :  { %368 = vmatprep.mubr.bf16.mxu1 %v650_v12  ;;  %v656_v23 = vld [vmem:[#allocation3 + $0x50] ss:$8 sps:$4 sm:$0xff]   ;;  %v657_v24 = vld [vmem:[#allocation3 + $0x24] ss:$8 sps:$4 sm:$0xff]   ;;  %v661_v26 = vld [vmem:[#allocation3 + $0x20] ss:$8 sps:$4 sm:$0xff]  }
  0x26   :  { %v659_v25 = vld [vmem:[#allocation3 + $0x64] ss:$8 sps:$4 sm:$0xff]   ;;  %v662_v27 = vld [vmem:[#allocation3 + $0x60] ss:$8 sps:$4 sm:$0xff]   ;;  %v663_v28 = vld [vmem:[#allocation3 + $0x34] ss:$8 sps:$4 sm:$0xff]  }
  0x27   :  { %547 = vmatpush3.bf16.msra.mxu0 %v634_v5  ;;  %616 = vmatpush3.bf16.msra.mxu1 %v634_v5  ;;  %v665_v29 = vld [vmem:[#allocation3 + $0x74] ss:$8 sps:$4 sm:$0xff]   ;;  %v667_v30 = vld [vmem:[#allocation3 + $0x30] ss:$8 sps:$4 sm:$0xff]   ;;  %v774_v35 = vld [vmem:[%s800_s2] ss:$0 sm:$0xff] }
  0x28   :  { %548 = vmatprep.subr.bf16.mxu0 %v635_v6  ;;  %609 = vmatprep.subr.bf16.mxu1 %v635_v6  ;;  %v668_v31 = vld [vmem:[#allocation3 + $0x70] ss:$8 sps:$4 sm:$0xff]   ;;  %s741_s2 = smov [#allocation8]  }
  0x29   :  { %s496_s26 = sshll.u32 %s741_s2, 4  ;;  %s497_s26 = int_to_ptr.vmem [resolvable:$true] %s496_s26 }
  0x2a   :  { %s709_s27 = scalar_lea.vmem %s497_s26, 2048  ;;  %p714_p11 = scmp.lt.s32.totalorder %s497_s26, %s497_s26 }
  0x2b   :  { %549 = vmatpush3.bf16.msra.mxu0 %v636_v7  ;;  %617 = vmatpush3.bf16.msra.mxu1 %v636_v7  ;;  %p710_p10 = scmp.ne.s32.totalorder %s497_s26, %s709_s27  ;;  %p715_p12 = scmp.lt.s32.totalorder %s709_s27, %s709_s27 }
  0x2c   :  { %550 = vmatprep.subr.bf16.mxu0 %v637_v8  ;;  %610 = vmatprep.subr.bf16.mxu1 %v637_v8 }
  0x2d   :  { %p716_p13 = por %p715_p12, %p714_p11 }
  0x2f   :  { %551 = vmatpush3.bf16.msra.mxu0 %v638_v9  ;;  %618 = vmatpush3.bf16.msra.mxu1 %v638_v9  ;;  %p717_p0 = pnand %p716_p13, %p710_p10 }
  0x30   :  { %552 = vmatprep.subr.bf16.mxu0 %v639_v10  ;;  %611 = vmatprep.subr.bf16.mxu1 %v639_v10 }
  0x33   :  { %553 = vmatpush3.bf16.msra.mxu0 %v640_v13  ;;  %619 = vmatpush3.bf16.msra.mxu1 %v640_v13 }
  0x34   :  { %554 = vmatprep.subr.bf16.mxu0 %v641_v14  ;;  %612 = vmatprep.subr.bf16.mxu1 %v641_v14 }
  0x37   :  { %555 = vmatpush3.bf16.msra.mxu0 %v642_v15  ;;  %620 = vmatpush3.bf16.msra.mxu1 %v642_v15 }
  0x38   :  { %556 = vmatprep.subr.bf16.mxu0 %v643_v16  ;;  %613 = vmatprep.subr.bf16.mxu1 %v643_v16 }
  0x3b   :  { %557 = vmatpush3.bf16.msra.mxu0 %v644_v17  ;;  %621 = vmatpush3.bf16.msra.mxu1 %v644_v17 }
  0x3e   :  { %337 = vmatmul.mubr.bf16.vlgmr.msra.gmra.mxu0 %v645_v18  ;;  %369 = vmatmul.mubr.bf16.vlgmr.msra.gmra.mxu1 %v648_v19 }
  0x3f   :  { %344 = vmatprep.mubr.bf16.mxu0 %v651_v20  ;;  %376 = vmatprep.mubr.bf16.mxu1 %v653_v21 }
  0x46   :  { %345 = vmatmul.mubr.bf16.gmra.mxu0 %v655_v22  ;;  %377 = vmatmul.mubr.bf16.gmra.mxu1 %v656_v23 }
  0x47   :  { %352 = vmatprep.mubr.bf16.mxu0 %v657_v24  ;;  %384 = vmatprep.mubr.bf16.mxu1 %v659_v25 }
  0x4e   :  { %353 = vmatmul.mubr.bf16.gmra.mxu0 %v661_v26  ;;  %385 = vmatmul.mubr.bf16.gmra.mxu1 %v662_v27 }
  0x4f   :  { %360 = vmatprep.mubr.bf16.mxu0 %v663_v28  ;;  %392 = vmatprep.mubr.bf16.mxu1 %v665_v29 }
  0x56   :  { %361 = vmatmul.mubr.bf16.gmra.mxu0 %v667_v30  ;;  %393 = vmatmul.mubr.bf16.gmra.mxu1 %v668_v31 }
  0xfe   :  { %v558_v32 = vpop.f32.mrf.mxu0  ;;  %v582_v33 = vpop.f32.mrf.mxu1 }
 0x100   :  { %v559_v34 = vpop.f32.mrf.mxu0  ;;  %v583_v36 = vpop.f32.mrf.mxu1 }
 0x101   :  { %v560_v37 = vadd.f32 %v559_v34, %v558_v32  ;;  %v584_v38 = vadd.f32 %v583_v36, %v582_v33 }
 0x102   :  { %v561_v39 = vpop.f32.mrf.mxu0  ;;  %v585_v40 = vpop.f32.mrf.mxu1 }
 0x103   :  { %v459_v41 = vadd.f32 %v560_v37, %v774_v35  ;;  %v467_v42 = vadd.f32 %v584_v38, %v774_v35 }
 0x104   :  { %v562_v43 = vpop.f32.mrf.mxu0  ;;  %v586_v44 = vpop.f32.mrf.mxu1 }
 0x105   :  { %475 = vst [vmem:[#allocation8] sm:$0xff] %v459_v41  ;;  %483 = vst [vmem:[#allocation8 + $0x40] sm:$0xff] %v467_v42  ;;  %v563_v45 = vadd.f32 %v562_v43, %v561_v39  ;;  %v587_v46 = vadd.f32 %v586_v44, %v585_v40 }
 0x106   :  { %v564_v47 = vpop.f32.mrf.mxu0  ;;  %v588_v48 = vpop.f32.mrf.mxu1 }
 0x107   :  { %v460_v49 = vadd.f32 %v563_v45, %v774_v35  ;;  %v468_v50 = vadd.f32 %v587_v46, %v774_v35 }
 0x108   :  { %v565_v51 = vpop.f32.mrf.mxu0  ;;  %v589_v52 = vpop.f32.mrf.mxu1 }
 0x109   :  { %476 = vst [vmem:[#allocation8 + $0x8] sm:$0xff] %v460_v49  ;;  %484 = vst [vmem:[#allocation8 + $0x48] sm:$0xff] %v468_v50  ;;  %v566_v53 = vadd.f32 %v565_v51, %v564_v47  ;;  %v590_v54 = vadd.f32 %v589_v52, %v588_v48 }
 0x10a   :  { %v567_v55 = vpop.f32.mrf.mxu0  ;;  %v591_v56 = vpop.f32.mrf.mxu1 }
 0x10b   :  { %v461_v57 = vadd.f32 %v566_v53, %v774_v35  ;;  %v469_v58 = vadd.f32 %v590_v54, %v774_v35 }
 0x10c   :  { %v568_v59 = vpop.f32.mrf.mxu0  ;;  %v592_v60 = vpop.f32.mrf.mxu1 }
 0x10d   :  { %477 = vst [vmem:[#allocation8 + $0x10] sm:$0xff] %v461_v57  ;;  %485 = vst [vmem:[#allocation8 + $0x50] sm:$0xff] %v469_v58  ;;  %v569_v61 = vadd.f32 %v568_v59, %v567_v55  ;;  %v593_v62 = vadd.f32 %v592_v60, %v591_v56 }
 0x10e   :  { %v570_v63 = vpop.f32.mrf.mxu0  ;;  %v594_v0 = vpop.f32.mrf.mxu1 }
 0x10f   :  { %v462_v1 = vadd.f32 %v569_v61, %v774_v35  ;;  %v470_v2 = vadd.f32 %v593_v62, %v774_v35 }
 0x110   :  { %v571_v3 = vpop.f32.mrf.mxu0  ;;  %v595_v4 = vpop.f32.mrf.mxu1 }
 0x111   :  { %478 = vst [vmem:[#allocation8 + $0x18] sm:$0xff] %v462_v1  ;;  %486 = vst [vmem:[#allocation8 + $0x58] sm:$0xff] %v470_v2  ;;  %v572_v5 = vadd.f32 %v571_v3, %v570_v63  ;;  %v596_v6 = vadd.f32 %v595_v4, %v594_v0 }
 0x112   :  { %v573_v7 = vpop.f32.mrf.mxu0  ;;  %v597_v8 = vpop.f32.mrf.mxu1 }
 0x113   :  { %v463_v9 = vadd.f32 %v572_v5, %v774_v35  ;;  %v471_v10 = vadd.f32 %v596_v6, %v774_v35 }
 0x114   :  { %v574_v11 = vpop.f32.mrf.mxu0  ;;  %v598_v12 = vpop.f32.mrf.mxu1 }
 0x115   :  { %479 = vst [vmem:[#allocation8 + $0x20] sm:$0xff] %v463_v9  ;;  %487 = vst [vmem:[#allocation8 + $0x60] sm:$0xff] %v471_v10  ;;  %v575_v13 = vadd.f32 %v574_v11, %v573_v7  ;;  %v599_v14 = vadd.f32 %v598_v12, %v597_v8 }
 0x116   :  { %v576_v15 = vpop.f32.mrf.mxu0  ;;  %v600_v16 = vpop.f32.mrf.mxu1 }
 0x117   :  { %v464_v17 = vadd.f32 %v575_v13, %v774_v35  ;;  %v472_v18 = vadd.f32 %v599_v14, %v774_v35 }
 0x118   :  { %v577_v19 = vpop.f32.mrf.mxu0  ;;  %v601_v20 = vpop.f32.mrf.mxu1 }
 0x119   :  { %480 = vst [vmem:[#allocation8 + $0x28] sm:$0xff] %v464_v17  ;;  %488 = vst [vmem:[#allocation8 + $0x68] sm:$0xff] %v472_v18  ;;  %v578_v21 = vadd.f32 %v577_v19, %v576_v15  ;;  %v602_v22 = vadd.f32 %v601_v20, %v600_v16 }
 0x11a   :  { %v579_v23 = vpop.f32.mrf.mxu0  ;;  %v603_v24 = vpop.f32.mrf.mxu1 }
 0x11b   :  { %v465_v25 = vadd.f32 %v578_v21, %v774_v35  ;;  %v473_v26 = vadd.f32 %v602_v22, %v774_v35 }
 0x11c   :  { %v580_v27 = vpop.f32.mrf.mxu0  ;;  %v604_v28 = vpop.f32.mrf.mxu1 }
 0x11d   :  { %481 = vst [vmem:[#allocation8 + $0x30] sm:$0xff] %v465_v25  ;;  %489 = vst [vmem:[#allocation8 + $0x70] sm:$0xff] %v473_v26  ;;  %v581_v29 = vadd.f32 %v580_v27, %v579_v23  ;;  %v605_v30 = vadd.f32 %v604_v28, %v603_v24 }
 0x11f   :  { %v466_v31 = vadd.f32 %v581_v29, %v774_v35  ;;  %v474_v32 = vadd.f32 %v605_v30, %v774_v35 }
 0x121   :  { %482 = vst [vmem:[#allocation8 + $0x38] sm:$0xff] %v466_v31  ;;  %490 = vst [vmem:[#allocation8 + $0x78] sm:$0xff] %v474_v32 }
 0x122   :  { %720 = shalt.err (!%p717_p0)
}
 0x123   :  { %502 = dma.vmem_to_hbm [thread:$0]  %s497_s26, 2048, %s801_s3, [#allocation5], %s736_s15, %s736_s15, %s737_s16  }
 0x124   :  { %733 = dma.done.wait [#allocation5], 2048  }
 0x125   :  { %734 = vsyncadd [#allocation5], 4294965248 }
 0x126   :  { %506 = vsyncpa [#allocation4], 1 }
 0x127   :  { %507 = vsyncpa [#allocation7], 1 }
 0x128   :  { %508 = vsyncpa [#allocation5], 1 }

</bundles_post_ra>
